<compile_context>
chip_gen: v7x
topology: tpu7x:2x2x1
jax: 0.10.0
libtpu: 0.0.40
codegen_flags: <defaults>
</compile_context>

<pallas_src>
import functools

import jax
import jax.numpy as jnp
import numpy as np
from jax.experimental import pallas as pl
from jax.experimental.pallas import tpu as pltpu


def _xy_kernel(*refs, n, inv_fx, inv_fy, u0, v0, tm, w):
    # refs[:n]  : n depth inputs, each (TM, W) f32
    # refs[n:]  : n outputs, each (2, TM, W) f32  -> [x, y] planes
    row0 = pl.program_id(0) * tm
    rows = (jax.lax.broadcasted_iota(jnp.int32, (tm, w), 0) + row0).astype(jnp.float32)
    cols = jax.lax.broadcasted_iota(jnp.int32, (tm, w), 1).astype(jnp.float32)
    x_scale = (cols - u0) * inv_fx          # (u - u0) / fx
    y_scale = (rows - v0) * inv_fy          # (v - v0) / fy
    for i in range(n):
        ad = jnp.abs(refs[i][...])          # |depth|
        refs[n + i][0] = x_scale * ad       # x plane
        refs[n + i][1] = y_scale * ad       # y plane
    # z plane == depth itself: intentionally not re-emitted (reused on host).


def _round_up8(x):
    return max(8, ((x + 7) // 8) * 8)


def _choose_row_tile(h, w, n_imgs, budget_bytes=16 * 1024 * 1024):
    """Row tile: multiple of 8 (or full H), double-buffered f32 working set of
    n_imgs * (1 input + 2 output planes) kept under `budget_bytes`, capped at
    512 rows, and sized so each image yields ~8 pipelined grid steps."""
    if h <= 8:
        return h                                    # block dim == full dim: always legal
    per_row = 2 * n_imgs * (1 + 2) * w * 4          # double-buffered, f32
    cap = max(8, min(512, (budget_bytes // per_row) // 8 * 8))
    target = _round_up8(-(-h // 8))                 # aim for >= 8 row tiles per image
    return min(cap, target)


def transfer_xy_planes(depths, inv_fx, inv_fy, u0, v0):
    """depths: list of (H, W) f32 -> list of (2, H, W) f32 (x, y planes)."""
    n = len(depths)
    h, w = depths[0].shape
    tm = _choose_row_tile(h, w, n)
    kernel = functools.partial(_xy_kernel, n=n, inv_fx=inv_fx, inv_fy=inv_fy,
                               u0=u0, v0=v0, tm=tm, w=w)
    outs = pl.pallas_call(
        kernel,
        out_shape=tuple(jax.ShapeDtypeStruct((2, h, w), jnp.float32) for _ in range(n)),
        grid=(pl.cdiv(h, tm),),                     # tail block is masked on write
        in_specs=[pl.BlockSpec((tm, w), lambda i: (i, 0)) for _ in range(n)],
        out_specs=tuple(pl.BlockSpec((2, tm, w), lambda i: (0, i, 0)) for _ in range(n)),
        compiler_params=pltpu.CompilerParams(
            dimension_semantics=("parallel",),
            vmem_limit_bytes=32 * 1024 * 1024,
        ),
    )(*depths)
    if not isinstance(outs, (list, tuple)):
        outs = [outs]
    return list(outs)


class VisualizationXYZPallas:
    """Pallas port of Visualization_XYZ (depth -> point cloud)."""

    def __init__(self, focal_x, focal_y, input_size):
        self.fx = float(focal_x)
        self.fy = float(focal_y)
        self.inv_fx = 1.0 / self.fx
        self.inv_fy = 1.0 / self.fy
        self.input_size = input_size
        self.u0 = float(input_size[1] // 2)   # matches torch: input_size[1] // 2
        self.v0 = float(input_size[0] // 2)

    @staticmethod
    def _to_point_cloud(xy_planes, depth_hw):
        # Host-side AoS interleave (the torch module returns pw.cpu().numpy()
        # here anyway, right before PLY/imshow file I/O).  Keeping the device
        # output SoA avoids a full lane-width-3 transpose pass over all planes
        # on TPU, and z is just the original depth map.
        xy = np.asarray(xy_planes)            # (2, H, W)
        d = np.asarray(depth_hw)              # (H, W)
        return np.stack([xy[0], xy[1], d], axis=-1).reshape(-1, 3)

    def transfer_xyz(self, depth):
        h, w = depth.shape[-2], depth.shape[-1]
        d = jnp.asarray(depth, jnp.float32).reshape(h, w)
        (xy,) = transfer_xy_planes([d], self.inv_fx, self.inv_fy, self.u0, self.v0)
        return self._to_point_cloud(xy, d)

    def forward(self, pred_depth, gt_depth):
        # TODO(synk): imshow() saves a JPG via PIL/matplotlib and write_*_ply is
        # PlyData file I/O (host-side, no Pallas equivalent); we run the module's
        # tensor path (transfer_xyz) for both depth maps in one fused pallas_call.
        h, w = pred_depth.shape[-2], pred_depth.shape[-1]
        pred = jnp.asarray(pred_depth, jnp.float32).reshape(h, w)
        gt = jnp.asarray(gt_depth, jnp.float32).reshape(h, w)
        pred_xy, gt_xy = transfer_xy_planes(
            [pred, gt], self.inv_fx, self.inv_fy, self.u0, self.v0)
        return self._to_point_cloud(pred_xy, pred), self._to_point_cloud(gt_xy, gt)


if __name__ == "__main__":
    H, W = 16, 16
    key = jax.random.PRNGKey(0)
    k1, k2 = jax.random.split(key)
    pred_depth = jax.random.uniform(k1, (1, 1, H, W), dtype=jnp.float32) * 10.0
    gt_depth = jax.random.uniform(k2, (1, 1, H, W), dtype=jnp.float32) * 10.0

    viz = VisualizationXYZPallas(focal_x=256.0, focal_y=256.0, input_size=(H, W))
    pred_pw, gt_pw = viz.forward(pred_depth, gt_depth)
    jax.block_until_ready((pred_pw, gt_pw))

    # plain-JAX/numpy reference mirroring the torch transfer_xyz math
    x_grid = np.tile(np.arange(0, W, dtype=np.float32), (H, 1))
    y_grid = np.tile(np.arange(0, H, dtype=np.float32), (W, 1)).T
    u_u0 = x_grid - viz.u0
    v_v0 = y_grid - viz.v0

    def ref_xyz(depth):
        d = np.asarray(depth).reshape(H, W)
        x = u_u0 * np.abs(d) / viz.fx
        y = v_v0 * np.abs(d) / viz.fy
        return np.stack([x, y, d], axis=0).transpose(1, 2, 0).reshape(-1, 3)

    assert pred_pw.shape == (H * W, 3) and gt_pw.shape == (H * W, 3)
    np.testing.assert_allclose(np.asarray(pred_pw), ref_xyz(pred_depth),
                               rtol=1e-5, atol=1e-5)
    np.testing.assert_allclose(np.asarray(gt_pw), ref_xyz(gt_depth),
                               rtol=1e-5, atol=1e-5)
    print("KERNEL_OK")
</pallas_src>

<mosaic_0001>
module attributes {stable_mosaic.version = 11 : i64} {
  func.func @_xy_kernel(%arg0: i32, %arg1: memref<8x16xf32, #tpu.memory_space<vmem>>, %arg2: memref<8x16xf32, #tpu.memory_space<vmem>>, %arg3: memref<2x8x16xf32, #tpu.memory_space<vmem>>, %arg4: memref<2x8x16xf32, #tpu.memory_space<vmem>>) attributes {dimension_semantics = [#tpu.dimension_semantics<parallel>], iteration_bounds = array<i64: 2>, scalar_prefetch = 0 : i64, scratch_operands = 0 : i64, tpu.core_type = #tpu.core_type<tc>, window_params = [{transform_indices = @transform_0, window_bounds = array<i64: 8, 16>}, {transform_indices = @transform_1, window_bounds = array<i64: 8, 16>}, {transform_indices = @transform_2, window_bounds = array<i64: 2, 8, 16>}, {transform_indices = @transform_3, window_bounds = array<i64: 2, 8, 16>}]} {
    %c8_i32 = arith.constant 8 : i32
    %0 = arith.muli %arg0, %c8_i32 : i32
    %1 = tpu.iota {dimensions = array<i32: 0>} : vector<8x16xi32>
    %2 = vector.broadcast %0 : i32 to vector<8x16xi32>
    %3 = arith.addi %1, %2 : vector<8x16xi32>
    %4 = arith.sitofp %3 : vector<8x16xi32> to vector<8x16xf32>
    %5 = tpu.iota {dimensions = array<i32: 1>} : vector<8x16xi32>
    %6 = arith.sitofp %5 : vector<8x16xi32> to vector<8x16xf32>
    %cst = arith.constant 8.000000e+00 : f32
    %7 = vector.broadcast %cst : f32 to vector<8x16xf32>
    %8 = arith.subf %6, %7 : vector<8x16xf32>
    %cst_0 = arith.constant 3.906250e-03 : f32
    %9 = vector.broadcast %cst_0 : f32 to vector<8x16xf32>
    %10 = arith.mulf %8, %9 : vector<8x16xf32>
    %cst_1 = arith.constant 8.000000e+00 : f32
    %11 = vector.broadcast %cst_1 : f32 to vector<8x16xf32>
    %12 = arith.subf %4, %11 : vector<8x16xf32>
    %cst_2 = arith.constant 3.906250e-03 : f32
    %13 = vector.broadcast %cst_2 : f32 to vector<8x16xf32>
    %14 = arith.mulf %12, %13 : vector<8x16xf32>
    %c0 = arith.constant 0 : index
    %c0_3 = arith.constant 0 : index
    %15 = vector.load %arg1[%c0, %c0_3] : memref<8x16xf32, #tpu.memory_space<vmem>>, vector<8x16xf32>
    %16 = math.absf %15 : vector<8x16xf32>
    %17 = arith.mulf %10, %16 : vector<8x16xf32>
    %c0_4 = arith.constant 0 : index
    %c0_5 = arith.constant 0 : index
    %c0_6 = arith.constant 0 : index
    %18 = vector.load %arg3[%c0_4, %c0_5, %c0_6] : memref<2x8x16xf32, #tpu.memory_space<vmem>>, vector<1x8x16xf32>
    %19 = vector.shape_cast %18 : vector<1x8x16xf32> to vector<8x16xf32>
    %20 = vector.shape_cast %17 : vector<8x16xf32> to vector<1x8x16xf32>
    tpu.vector_store %arg3[%c0_4, %c0_5, %c0_6], %20 {strides = array<i32>} : memref<2x8x16xf32, #tpu.memory_space<vmem>>, vector<1x8x16xf32>,
    %21 = arith.mulf %14, %16 : vector<8x16xf32>
    %c1 = arith.constant 1 : index
    %c0_7 = arith.constant 0 : index
    %c0_8 = arith.constant 0 : index
    %22 = vector.load %arg3[%c1, %c0_7, %c0_8] : memref<2x8x16xf32, #tpu.memory_space<vmem>>, vector<1x8x16xf32>
    %23 = vector.shape_cast %22 : vector<1x8x16xf32> to vector<8x16xf32>
    %24 = vector.shape_cast %21 : vector<8x16xf32> to vector<1x8x16xf32>
    tpu.vector_store %arg3[%c1, %c0_7, %c0_8], %24 {strides = array<i32>} : memref<2x8x16xf32, #tpu.memory_space<vmem>>, vector<1x8x16xf32>,
    %c0_9 = arith.constant 0 : index
    %c0_10 = arith.constant 0 : index
    %25 = vector.load %arg2[%c0_9, %c0_10] : memref<8x16xf32, #tpu.memory_space<vmem>>, vector<8x16xf32>
    %26 = math.absf %25 : vector<8x16xf32>
    %27 = arith.mulf %10, %26 : vector<8x16xf32>
    %c0_11 = arith.constant 0 : index
    %c0_12 = arith.constant 0 : index
    %c0_13 = arith.constant 0 : index
    %28 = vector.load %arg4[%c0_11, %c0_12, %c0_13] : memref<2x8x16xf32, #tpu.memory_space<vmem>>, vector<1x8x16xf32>
    %29 = vector.shape_cast %28 : vector<1x8x16xf32> to vector<8x16xf32>
    %30 = vector.shape_cast %27 : vector<8x16xf32> to vector<1x8x16xf32>
    tpu.vector_store %arg4[%c0_11, %c0_12, %c0_13], %30 {strides = array<i32>} : memref<2x8x16xf32, #tpu.memory_space<vmem>>, vector<1x8x16xf32>,
    %31 = arith.mulf %14, %26 : vector<8x16xf32>
    %c1_14 = arith.constant 1 : index
    %c0_15 = arith.constant 0 : index
    %c0_16 = arith.constant 0 : index
    %32 = vector.load %arg4[%c1_14, %c0_15, %c0_16] : memref<2x8x16xf32, #tpu.memory_space<vmem>>, vector<1x8x16xf32>
    %33 = vector.shape_cast %32 : vector<1x8x16xf32> to vector<8x16xf32>
    %34 = vector.shape_cast %31 : vector<8x16xf32> to vector<1x8x16xf32>
    tpu.vector_store %arg4[%c1_14, %c0_15, %c0_16], %34 {strides = array<i32>} : memref<2x8x16xf32, #tpu.memory_space<vmem>>, vector<1x8x16xf32>,
    return
  }
  func.func @transform_0(%arg0: i32) -> (i32, i32) {
    %c0_i32 = arith.constant 0 : i32
    %c0_i32_0 = arith.constant 0 : i32
    return %arg0, %c0_i32 : i32, i32
  }
  func.func @transform_1(%arg0: i32) -> (i32, i32) {
    %c0_i32 = arith.constant 0 : i32
    %c0_i32_0 = arith.constant 0 : i32
    return %arg0, %c0_i32 : i32, i32
  }
  func.func @transform_2(%arg0: i32) -> (i32, i32, i32) {
    %c0_i32 = arith.constant 0 : i32
    %c0_i32_0 = arith.constant 0 : i32
    %c0_i32_1 = arith.constant 0 : i32
    return %c0_i32, %arg0, %c0_i32_0 : i32, i32, i32
  }
  func.func @transform_3(%arg0: i32) -> (i32, i32, i32) {
    %c0_i32 = arith.constant 0 : i32
    %c0_i32_0 = arith.constant 0 : i32
    %c0_i32_1 = arith.constant 0 : i32
    return %c0_i32, %arg0, %c0_i32_0 : i32, i32, i32
  }
}

</mosaic_0001>

<bundles_post_ra>
// kernel: tpu_custom_call.1
= control target key start
LH: loop header
LB: loop body
LE: loop exit
PB: predicated region body
PF: predicated region fallthrough
CT: control target
= control target key end

     0   :  { %9 = vsyncpa [#allocation3], 0  ;;  %s946_s0 = inlined_call_operand.hbm [shape: f32[16,16], index: 0, kind: input, shape index: {}]   ;;  %s947_s1 = inlined_call_operand.hbm [shape: f32[16,16], index: 1, kind: input, shape index: {}]   ;;  %s948_s2 = inlined_call_operand.hbm [shape: f32[2,16,16], index: 2, kind: output, shape index: {0}]   ;;  %s949_s3 = inlined_call_operand.hbm [shape: f32[2,16,16], index: 3, kind: output, shape index: {1}]  }
   0x1   :  { %11 = vsyncpa [#allocation3 + $0x1], 0 }
   0x2   :  { %12 = vsyncpa [#allocation6], 0 }
   0x3   :  { %14 = vsyncpa [#allocation6 + $0x1], 0 }
   0x4   :  { %15 = vsyncpa [#allocation4], 0 }
   0x5   :  { %17 = vsyncpa [#allocation4 + $0x1], 0 }
   0x6   :  { %18 = vsyncpa [#allocation9], 0 }
   0x7   :  { %20 = vsyncpa [#allocation9 + $0x1], 0  ;;  %s696_s12 = smov 0   ;;  %s698_s13 = smov 0  }
   0x8   :  { %s700_s14 = smov 0   ;;  %s702_s15 = smov 0  }
   0x9 LB: > { %s717_s16 = sadd.s32 4294967295, %s667_s15   ;;  %s423_s17 = sadd.s32 4294967294, %s667_s15   ;;  %s667_s15 = sphi %s702_s15, %s968_s15   ;;  %s663_s14 = sphi %s700_s14, %s967_s14   ;;  %s659_s13 = sphi %s698_s13, %s966_s13   ;;  %s655_s12 = sphi %s696_s12, %s965_s12  }
   0xa   : > { %s721_s18 = sadd.s32 1, %s667_s15   ;;  %s33_s19 = sadd.s32 1, %s663_s14 }
   0xb   : > { %s30_s20 = ssub.s32 %s667_s15, %s721_s18  ;;  %p40_p0 = scmp.ne.s32.totalorder %s663_s14, %s659_s13 }
   0xc   : > { %p31_p1 = scmp.eq.s32.totalorder %s30_s20, 0  ;;  %p41_p2 = scmp.eq.s32.totalorder %s667_s15, 0 }
   0xd   : > { %p46_p3 = scmp.ne.s32.totalorder %s659_s13, %s655_s12  ;;  %p47_p4 = scmp.eq.s32.totalorder %s717_s16, 0 }
   0xe   : > { %s733_s21 = scalar_select %p31_p1, %s663_s14, %s33_s19  }
   0xf   : > { %p735_p5 = por %p41_p2, %p40_p0  ;;  %p739_p6 = por %p47_p4, %p46_p3 }
  0x10   : > { %p96_p7 = scmp.eq.s32.totalorder %s717_s16, 1  ;;  %p102_p8 = scmp.eq.s32.totalorder %s423_s17, 1 }
  0x11   : > { %s953_s23 = scalar_select %p739_p6, 1, 0 }
  0x12   : > { %p468_p10 = scmp.lt.s32.totalorder %s667_s15, 2  ;;  %p746_p11 = por %p96_p7, %p40_p0 }
  0x13   : > { %p750_p12 = por %p102_p8, %p46_p3  ;;  %s755_s26 = sand.u32 1, %s663_s14  }
  0x14   : > { %s954_s24 = scalar_select %p746_p11, 1, 0 }
  0x15   : > { %s955_s25 = scalar_select %p750_p12, 1, 0 }
  0x16   : > { %s427_s27 = sshll.u32 %s667_s15, 7  ;;  %s426_s28 = sshll.u32 %s755_s26, 3 }
  0x17   : > { %s764_s4 = scalar_lea.hbm %s946_s0, %s427_s27  ;;  %s152_s5 = scalar_lea.vmem [#allocation2], %s426_s28 }
  0x18   : > { %s159_s6 = sshll.u32 %s152_s5, 4  ;;  %p770_p13 = pnand %p468_p10, %p735_p5  ;;  %s774_s6 = int_to_ptr.vmem [resolvable:$true] %s159_s6 }
  0x19   : > { %s149_s8 = scalar_lea.sflag [#allocation3], %s755_s26  ;;  %s505_s9 = scalar_lea.hbm %s764_s4, 128 }
  0x1a   : > { %p506_p2 = scmp.ne.s32.totalorder %s764_s4, %s505_s9  ;;  %p507_p3 = pneg %p770_p13 }
  0x1b   : > { %s510_s17 = scalar_lea.hbm %s946_s0, 256  ;;  %p511_p5 = scmp.lt.u32.totalorder %s764_s4, %s946_s0 }
  0x1c   : > { %p508_p4 = pnand %p507_p3, %p506_p2  ;;  %p512_p8 = scmp.lt.u32.totalorder %s510_s17, %s505_s9 }
  0x1d   : > { %p514_p9 = scmp.lt.u32.totalorder %s505_s9, %s764_s4 }
  0x1e   : > { %p509_p7 = pneg %p508_p4  ;;  %p513_p10 = por %p512_p8, %p511_p5 }
  0x20   : > { %p515_p0 = por %p514_p9, %p513_p10 }
  0x22   : > { %p516_p1 = pnand %p515_p0, %p509_p7 }
  0x24   : > { %519 = shalt.err (!%p516_p1)
}
  0x25   : > { %s520_s22 = scalar_lea.vmem %s774_s6, 128  ;;  %s669_s29 = smov [#allocation2]  }
  0x26   : > { %p521_p2 = scmp.ne.s32.totalorder %s774_s6, %s520_s22  ;;  %s525_s30 = sshll.u32 %s669_s29, 4  ;;  %s526_s30 = int_to_ptr.vmem [resolvable:$false] %s525_s30 }
  0x27   : > { %s527_s5 = scalar_lea.vmem %s526_s30, 256  ;;  %p528_p11 = scmp.lt.s32.totalorder %s774_s6, %s526_s30 }
  0x28   : > { %p523_p4 = pnand %p521_p2, %p507_p3  ;;  %p529_p5 = scmp.lt.s32.totalorder %s527_s5, %s520_s22 }
  0x2a   : > { %p524_p12 = pneg %p523_p4  ;;  %p530_p8 = por %p529_p5, %p528_p11 }
  0x2c   : > { %p531_p9 = pnand %p530_p8, %p524_p12 }
  0x2e   : > { %534 = shalt.err (!%p531_p9)
}
  0x2f   : > { %457 = dma.hbm_to_vmem [thread:$0]  (!%p770_p13), %s764_s4, 128, %s774_s6, %s149_s8  }
  0x30   : > { %p957_p0 = scmp.lt.s32.totalorder %s667_s15, 3  ;;  %p958_p1 = scmp.ge.s32.totalorder %s667_s15, 1 }
  0x31   : > { %s817_s17 = scalar_lea.hbm %s947_s1, %s427_s27  ;;  %s170_s19 = scalar_lea.vmem [#allocation5], %s426_s28 }
  0x32   : > { %p808_p7 = pnand %p958_p1, %p957_p0  ;;  %s177_s20 = sshll.u32 %s170_s19, 4  ;;  %s178_s20 = int_to_ptr.vmem [resolvable:$true] %s177_s20 }
  0x33   : > { %s167_s4 = scalar_lea.sflag [#allocation6], %s755_s26  ;;  %s535_s6 = scalar_lea.hbm %s817_s17, 128 }
  0x34   : > { %s959_s9 = scalar_select %p808_p7, 1, 0 }
  0x35   : > { %p536_p11 = scmp.ne.s32.totalorder %s817_s17, %s535_s6  ;;  %s540_s27 = scalar_lea.hbm %s947_s1, 256 }
  0x36   : > { %p541_p2 = scmp.lt.u32.totalorder %s817_s17, %s947_s1  ;;  %p542_p4 = scmp.lt.u32.totalorder %s540_s27, %s535_s6 }
  0x37   : > { %p538_p12 = pnand %p536_p11, %p507_p3  ;;  %p544_p8 = scmp.lt.u32.totalorder %s535_s6, %s817_s17 }
  0x38   : > { %p543_p5 = por %p542_p4, %p541_p2 }
  0x39   : > { %p539_p10 = pneg %p538_p12 }
  0x3a   : > { %p545_p9 = por %p544_p8, %p543_p5 }
  0x3c   : > { %p546_p0 = pnand %p545_p9, %p539_p10 }
  0x3e   : > { %549 = shalt.err (!%p546_p0)
}
  0x3f   : > { %s550_s26 = scalar_lea.vmem %s178_s20, 128  ;;  %s670_s28 = smov [#allocation5]  }
  0x40   : > { %p551_p1 = scmp.ne.s32.totalorder %s178_s20, %s550_s26  ;;  %s555_s5 = sshll.u32 %s670_s28, 4  ;;  %s556_s5 = int_to_ptr.vmem [resolvable:$false] %s555_s5 }
  0x41   : > { %s557_s10 = scalar_lea.vmem %s556_s5, 256  ;;  %p558_p6 = scmp.lt.s32.totalorder %s178_s20, %s556_s5 }
  0x42   : > { %p553_p11 = pnand %p551_p1, %p507_p3  ;;  %p559_p7 = scmp.lt.s32.totalorder %s557_s10, %s550_s26 }
  0x44   : > { %p554_p12 = pneg %p553_p11  ;;  %p560_p2 = por %p559_p7, %p558_p6 }
  0x46   : > { %p561_p4 = pnand %p560_p2, %p554_p12 }
  0x48   : > { %564 = shalt.err (!%p561_p4)
}
  0x49   : > { %460 = dma.hbm_to_vmem [thread:$0]  (!%p770_p13), %s817_s17, 128, %s178_s20, %s167_s4  }
  0x4a   : > { %p960_p10 = scmp.ne.s32.totalorder %s959_s9, 0 }
  0x4b   : > { %s844_s11 = sand.u32 (!%p960_p10), 1, %s659_s13   ;;  %p961_p3 = scmp.ne.s32.totalorder (!%p960_p10), %s953_s23, 0 }
  0x4c   : > { %186 = sbr.rel (%p960_p10) target bundleno = 138 (0x8a), region = 28  ;;  %s431_s19 = sshll.u32 (!%p960_p10), %s844_s11, 3 }
  0x4d   : > { %s189_s6 = scalar_lea.sflag (!%p960_p10), [#allocation3], %s844_s11  ;;  %s192_s8 = scalar_lea.vmem (!%p960_p10), [#allocation2], %s431_s19 }
  0x53   : > { %638 = dma.done.wait (%p961_p3), %s189_s6, 128  }
  0x54   : > { %640 = vsyncadd (%p961_p3), %s189_s6, 4294967168  ;;  %s198_s7 = scalar_lea.sflag [#allocation6], %s844_s11  ;;  %s201_s17 = scalar_lea.vmem [#allocation5], %s431_s19 }
  0x55   : > { %642 = dma.done.wait (%p961_p3), %s198_s7, 128  }
  0x56   : > { %644 = vsyncadd (%p961_p3), %s198_s7, 4294967168  ;;  %s433_s9 = sshll.u32 %s844_s11, 4  ;;  %v235_v0 = vlaneseq  ;;  %s435_s20 = sshll.u32 %s717_s16, 3  ;;  %v247_v8 = vld [vmem:[%s192_s8] sm:$0xff]  ;;  %v255_v9 = vld [vmem:[%s201_s17] sm:$0xff]  ;;  %vm250_vm0 = vcmask 130048  }
  0x57   : > { %v237_v1 = vstv %s435_s20  ;;  %s226_s4 = scalar_lea.vmem [#allocation7], %s433_s9  ;;  %s233_s27 = scalar_lea.vmem [#allocation8], %s433_s9  ;;  %v248_v11 = vand.u32 2147483647, %v247_v8  ;;  %v256_v13 = vand.u32 2147483647, %v255_v9 }
  0x58   : > { %v241_v2 = vand.u32 127, %v235_v0  ;;  %v236_v3 = vshrl.u32 %v235_v0, 7  ;;  %s280_s22 = sshll.u32 %s226_s4, 4  ;;  %s295_s23 = sshll.u32 %s233_s27, 4  ;;  %s860_s22 = int_to_ptr.vmem [resolvable:$true] %s280_s22  ;;  %s862_s23 = int_to_ptr.vmem [resolvable:$true] %s295_s23 }
  0x59   : > { %s442_s29 = sshll.u32 %s717_s16, 7  ;;  %s263_s19 = scalar_lea.sflag [#allocation4], %s844_s11 }
  0x5a   : > { %v242_v4 = vcvt.s32.f32 %v241_v2  ;;  %v238_v5 = vadd.s32 %v237_v1, %v236_v3  ;;  %s867_s16 = scalar_lea.hbm %s948_s2, %s442_s29  ;;  %s872_s10 = scalar_lea.hbm %s949_s3, %s442_s29 }
  0x5b   : > { %s565_s6 = scalar_lea.vmem %s860_s22, 256  ;;  %p962_p13 = scmp.ne.s32.totalorder %s954_s24, 0 }
  0x5c   : > { %v436_v6 = vadd.f32 -8.0, %v242_v4  ;;  %v239_v7 = vcvt.s32.f32 %v238_v5  ;;  %p566_p6 = scmp.ne.s32.totalorder %s860_s22, %s565_s6  ;;  %s671_s8 = smov [#allocation7]  }
  0x5d   : > { %s569_s7 = sshll.u32 %s671_s8, 4  ;;  %s570_s7 = int_to_ptr.vmem [resolvable:$false] %s569_s7 }
  0x5e   : > { %v244_v10 = vmul.f32 0.00390625, %v436_v6  ;;  %v437_v12 = vadd.f32 -8.0, %v239_v7  ;;  %p567_p7 = pnand %p566_p6, %p962_p13  ;;  %s571_s17 = scalar_lea.vmem %s570_s7, 512 }
  0x5f   : > { %p572_p8 = scmp.lt.s32.totalorder %s860_s22, %s570_s7  ;;  %p573_p9 = scmp.lt.s32.totalorder %s571_s17, %s565_s6 }
  0x60   : > { %v249_v14 = vmul.f32 %v248_v11, %v244_v10  ;;  %v246_v15 = vmul.f32 0.00390625, %v437_v12  ;;  %v257_v16 = vmul.f32 %v256_v13, %v244_v10  ;;  %p568_p5 = pneg %p567_p7 }
  0x61   : > { %p574_p0 = por %p573_p9, %p572_p8 }
  0x62   : > { %251 = vst.msk [vmem:[%s226_s4] sm:$0xff] %vm250_vm0, %v249_v14  ;;  %v252_v17 = vmul.f32 %v248_v11, %v246_v15  ;;  %258 = vst.msk [vmem:[%s233_s27] sm:$0xff] %vm250_vm0, %v257_v16  ;;  %v259_v18 = vmul.f32 %v256_v13, %v246_v15 }
  0x63   : > { %p575_p1 = pnand %p574_p0, %p568_p5 }
  0x64   : > { %438 = vst.msk [vmem:[%s226_s4 + $0x8] sm:$0xff] %vm250_vm0, %v252_v17  ;;  %439 = vst.msk [vmem:[%s233_s27 + $0x8] sm:$0xff] %vm250_vm0, %v259_v18 }
  0x65   : > { %578 = shalt.err (!%p575_p1)
}
  0x66   : > { %s579_s9 = scalar_lea.hbm %s867_s16, 256  ;;  %s583_s27 = scalar_lea.hbm %s948_s2, 512 }
  0x67   : > { %p580_p11 = scmp.ne.s32.totalorder %s867_s16, %s579_s9  ;;  %p584_p4 = scmp.lt.u32.totalorder %s867_s16, %s948_s2 }
  0x68   : > { %p585_p10 = scmp.lt.u32.totalorder %s583_s27, %s579_s9  ;;  %p587_p6 = scmp.lt.u32.totalorder %s579_s9, %s867_s16 }
  0x69   : > { %p581_p12 = pnand %p580_p11, %p962_p13 }
  0x6a   : > { %p586_p3 = por %p585_p10, %p584_p4 }
  0x6b   : > { %p582_p2 = pneg %p581_p12 }
  0x6c   : > { %p588_p7 = por %p587_p6, %p586_p3 }
  0x6e   : > { %p589_p5 = pnand %p588_p7, %p582_p2 }
  0x70   : > { %592 = shalt.err (!%p589_p5)
}
  0x71   : > { %s672_s26 = smov 128   ;;  %s673_s28 = smov 256  }
  0x72   : > { %s674_s5 = smov 8   ;;  %s268_s6 = scalar_lea.sflag [#allocation9], %s844_s11 }
  0x73   : > { %450 = dma.vmem_to_hbm [thread:$0]  (%p962_p13), %s860_s22, 256, %s867_s16, %s263_s19, %s672_s26, %s673_s28, %s674_s5  }
  0x74   : > { %s593_s8 = scalar_lea.vmem %s862_s23, 256  ;;  %s675_s7 = smov [#allocation8]  }
  0x75   : > { %p594_p8 = scmp.ne.s32.totalorder %s862_s23, %s593_s8  ;;  %s597_s17 = sshll.u32 %s675_s7, 4  ;;  %s598_s17 = int_to_ptr.vmem [resolvable:$false] %s597_s17 }
  0x76   : > { %s599_s9 = scalar_lea.vmem %s598_s17, 512  ;;  %p600_p1 = scmp.lt.s32.totalorder %s862_s23, %s598_s17 }
  0x77   : > { %p595_p9 = pnand %p594_p8, %p962_p13  ;;  %p601_p11 = scmp.lt.s32.totalorder %s599_s9, %s593_s8 }
  0x79   : > { %p596_p0 = pneg %p595_p9  ;;  %p602_p12 = por %p601_p11, %p600_p1 }
  0x7b   : > { %p603_p2 = pnand %p602_p12, %p596_p0 }
  0x7d   : > { %606 = shalt.err (!%p603_p2)
}
  0x7e   : > { %s607_s22 = scalar_lea.hbm %s872_s10, 256  ;;  %s611_s20 = scalar_lea.hbm %s949_s3, 512 }
  0x7f   : > { %p608_p4 = scmp.ne.s32.totalorder %s872_s10, %s607_s22  ;;  %p612_p6 = scmp.lt.u32.totalorder %s872_s10, %s949_s3 }
  0x80   : > { %p613_p7 = scmp.lt.u32.totalorder %s611_s20, %s607_s22  ;;  %p615_p8 = scmp.lt.u32.totalorder %s607_s22, %s872_s10 }
  0x81   : > { %p609_p10 = pnand %p608_p4, %p962_p13 }
  0x82   : > { %p614_p5 = por %p613_p7, %p612_p6 }
  0x83   : > { %p610_p3 = pneg %p609_p10 }
  0x84   : > { %p616_p9 = por %p615_p8, %p614_p5 }
  0x86   : > { %p617_p0 = pnand %p616_p9, %p610_p3 }
  0x88   : > { %620 = shalt.err (!%p617_p0)
}
  0x89   : > { %451 = dma.vmem_to_hbm [thread:$0]  (%p962_p13), %s862_s23, 256, %s872_s10, %s268_s6, %s672_s26, %s673_s28, %s674_s5  }
  0x8a PF: > { %s310_s29 = sand.u32 1, %s655_s12   ;;  %p963_p1 = scmp.ne.s32.totalorder %s955_s25, 0 }
  0x8b   : > { %p964_p11 = scmp.ge.s32.totalorder %s667_s15, 2  ;;  %s311_s30 = scalar_lea.sflag [#allocation4], %s310_s29 }
  0x8d   : > { %p462_p12 = pnand %p964_p11, %p963_p1 }
  0x8f   : > { %646 = dma.done.wait (!%p462_p12), %s311_s30, 256  }
  0x90   : > { %648 = vsyncadd (!%p462_p12), %s311_s30, 4294967040  ;;  %s320_s24 = scalar_lea.sflag [#allocation9], %s310_s29 }
  0x91   : > { %650 = dma.done.wait (!%p462_p12), %s320_s24, 256  }
  0x92   : > { %652 = vsyncadd (!%p462_p12), %s320_s24, 4294967040  ;;  %p23_p13 = scmp.ge.s32.totalorder %s721_s18, 4   ;;  %s965_s12 = smov %s659_s13 }
  0x93   : > { %s966_s13 = smov %s663_s14  ;;  %s967_s14 = smov %s733_s21 }
  0x94   : > { %s968_s15 = smov %s721_s18  ;;  %25 = sbr.rel (!%p23_p13) target bundleno = 9 (0x9), region = 105 }
  0x9b   :  { %325 = vsyncpa [#allocation3], 1 }
  0x9c   :  { %327 = vsyncpa [#allocation3 + $0x1], 1 }
  0x9d   :  { %328 = vsyncpa [#allocation6], 1 }
  0x9e   :  { %330 = vsyncpa [#allocation6 + $0x1], 1 }
  0x9f   :  { %331 = vsyncpa [#allocation4], 1 }
  0xa0   :  { %333 = vsyncpa [#allocation4 + $0x1], 1 }
  0xa1   :  { %334 = vsyncpa [#allocation9], 1 }
  0xa2   :  { %336 = vsyncpa [#allocation9 + $0x1], 1 }

</bundles_post_ra>
